<compile_context>
chip_gen: v7x
topology: tpu7x:2x2x1
jax: 0.10.0
libtpu: 0.0.40
codegen_flags: <defaults>
</compile_context>

<pallas_src>
import functools
import math

import jax
import jax.numpy as jnp
from jax.experimental import pallas as pl
from jax.experimental.pallas import tpu as pltpu


_SINGLE_BUFFER_OK = True   # flipped off if this jax build rejects pl.Buffered(1)


def _round_up(x, k):
    return ((x + k - 1) // k) * k


def _tpu_caps():
    """(tm_cap, te_cap, tile_vmem_budget_bytes, vmem_limit_bytes) per TPU generation."""
    kind = ""
    try:
        kind = jax.devices()[0].device_kind.lower()
    except Exception:
        pass
    # 128 MiB VMEM parts (v5e / v6e): big tiles + high scoped-VMEM limit.
    if any(tag in kind for tag in
           ("v5e", "v5 lite", "v5lite", "v6e", "v6 lite", "v6lite", "trillium")):
        return 1024, 4096, 88 << 20, 100 << 20
    # v7x (64 MiB VMEM) and unknown/future parts: conservative budget.
    return 512, 2048, 40 << 20, 48 << 20


def _fit_tiles(tm, te, *, in_feats, m_cols, acc_cols, out_pad, wa_rows, budget):
    """Shrink (tm, te) until the VMEM footprint fits the per-generation budget."""
    def footprint(tm_, te_):
        b = 2 * tm_ * te_ * 2                          # inc tile (bf16), double-buffered
        b += 2 * te_ * m_cols * 2                      # m tile (bf16), double-buffered
        b += tm_ * in_feats * 4                        # h tile, single-buffered
        b += tm_ * 4                                   # norm tile, single-buffered
        b += 2 * tm_ * out_pad * 4                     # output tile, double-buffered
        b += tm_ * acc_cols * 4                        # f32 accumulator scratch
        b += (in_feats + wa_rows + 3) * out_pad * 4    # resident weights / bias / affine
        return b

    while footprint(tm, te) > budget and te > 128:
        te = max(128, _round_up(te // 2, 128))
    while footprint(tm, te) > budget and tm > 16:
        tm = max(16, _round_up(tm // 2, 16))
    return tm, te


def _layernorm_relu(y, gamma, beta, out_feats):
    """LayerNorm (biased var, eps=1e-5) over the real out_feats lanes + ReLU.

    Relies on padded lanes of y being exactly zero (zero-padded weight cols / bias)."""
    inv_of = 1.0 / out_feats
    mean = jnp.sum(y, axis=-1, keepdims=True) * inv_of
    diff = y - mean
    lane = jax.lax.broadcasted_iota(jnp.int32, y.shape, 1)
    var = jnp.sum(jnp.where(lane < out_feats, diff * diff, 0.0),
                  axis=-1, keepdims=True) * inv_of
    inv_std = jax.lax.rsqrt(var + 1e-5)
    return jnp.maximum(diff * (gamma * inv_std) + beta, 0.0)


def gcn_layer_split_kernel(h_ref, m_ref, inc_ref, norm_ref, wh_ref, wa_ref,
                           b_ref, gamma_ref, beta_ref, o_ref, acc_ref, *, out_feats):
    e = pl.program_id(1)

    @pl.when(e == 0)
    def _():
        acc_ref[...] = jnp.zeros_like(acc_ref)

    # bf16 x bf16 MXU matmul, f32 accumulation; inc entries are exactly 0/1 (lossless).
    acc_ref[...] += jnp.dot(inc_ref[...], m_ref[...],
                            preferred_element_type=jnp.float32)

    @pl.when(e == pl.num_programs(1) - 1)
    def _():
        ah = acc_ref[...] * norm_ref[...]                               # (tm, added)
        # concat(h, ah) @ W.T  ==  h @ W_h + ah @ W_a   (weights VMEM-resident)
        y = (jnp.dot(h_ref[...], wh_ref[...], preferred_element_type=jnp.float32)
             + jnp.dot(ah, wa_ref[...], preferred_element_type=jnp.float32)
             + b_ref[...])                                              # (tm, out_pad)
        o_ref[...] = _layernorm_relu(y, gamma_ref[...], beta_ref[...],
                                     out_feats).astype(o_ref.dtype)


def gcn_layer_fold_kernel(h_ref, m_ref, inc_ref, norm_ref, wh_ref,
                          b_ref, gamma_ref, beta_ref, o_ref, acc_ref, *, out_feats):
    e = pl.program_id(1)

    @pl.when(e == 0)
    def _():
        acc_ref[...] = jnp.zeros_like(acc_ref)

    # m already carries W_a (folded in the wrapper): acc = inc @ (m @ W_a)
    acc_ref[...] += jnp.dot(inc_ref[...], m_ref[...],
                            preferred_element_type=jnp.float32)

    @pl.when(e == pl.num_programs(1) - 1)
    def _():
        y = (jnp.dot(h_ref[...], wh_ref[...], preferred_element_type=jnp.float32)
             + acc_ref[...] * norm_ref[...]
             + b_ref[...])                                              # (tm, out_pad)
        o_ref[...] = _layernorm_relu(y, gamma_ref[...], beta_ref[...],
                                     out_feats).astype(o_ref.dtype)


def gcn_layer_forward(h, m, inc, norm, w, b, gamma, beta, *, tm_max=None, te_max=None):
    """h: (N, in_feats)   m: (E, added)   inc: (N, E) dense 0/1 incidence (dst x edge)
       norm: (N, 1)       w: (out, in_feats + added) torch-style Linear weight
       b, gamma, beta: (out,)"""
    global _SINGLE_BUFFER_OK

    N, in_feats = h.shape
    E, added = m.shape
    out_feats = w.shape[0]

    tm_cap, te_cap, budget, vmem_limit = _tpu_caps()
    tm_max = tm_cap if tm_max is None else tm_max
    te_max = te_cap if te_max is None else te_max

    # split torch Linear weight (out, in_total) into the two matmul operands
    w_h = jnp.transpose(w[:, :in_feats]).astype(jnp.float32)       # (in_feats, out)
    w_a = jnp.transpose(w[:, in_feats:]).astype(jnp.float32)       # (added, out)

    # lane-dense output: pad out_feats (and weight cols / bias / affine) to x128
    out_pad = _round_up(max(out_feats, 128), 128)

    def pad_cols(x):
        return jnp.pad(x, ((0, 0), (0, out_pad - x.shape[1])))

    w_h_p = pad_cols(w_h)
    w_a_p = pad_cols(w_a)
    b_p = pad_cols(b.reshape(1, out_feats).astype(jnp.float32))
    g_p = pad_cols(gamma.reshape(1, out_feats).astype(jnp.float32))
    be_p = pad_cols(beta.reshape(1, out_feats).astype(jnp.float32))

    # Wide edge features: fold W_a into m (exact; diagonal norm commutes with the
    # right matmul) so the grid accumulates already-projected features.
    fold_wa = added >= out_pad
    if fold_wa:
        m_eff = m.astype(jnp.float32) @ w_a_p                      # (E, out_pad)
    else:
        m_eff = m.astype(jnp.float32)                              # (E, added)
    m_cols = m_eff.shape[1]
    acc_cols = out_pad if fold_wa else added

    # Tile sizes: N tiles x16 (bf16 sublane packing for inc), E tiles x128 (lanes),
    # then shrink against the per-generation VMEM budget.
    tm = min(tm_max, _round_up(N, 16))
    te = min(te_max, _round_up(E, 128))
    tm, te = _fit_tiles(tm, te, in_feats=in_feats, m_cols=m_cols, acc_cols=acc_cols,
                        out_pad=out_pad, wa_rows=0 if fold_wa else added, budget=budget)
    Np = _round_up(N, tm)
    Ep = _round_up(E, te)

    h_p = jnp.pad(h.astype(jnp.float32), ((0, Np - N), (0, 0)))
    norm_p = jnp.pad(norm.astype(jnp.float32), ((0, Np - N), (0, 0)))
    # m is rounded ONCE to bf16; accumulation stays f32 in the MXU.
    m_p = jnp.pad(m_eff, ((0, Ep - E), (0, 0))).astype(jnp.bfloat16)
    # incidence entries are exactly 0/1 -> bf16 is lossless; halves HBM traffic & VMEM
    inc_p = jnp.pad(inc, ((0, Np - N), (0, Ep - E))).astype(jnp.bfloat16)

    grid = (Np // tm, Ep // te)
    n_i_tiles = Np // tm

    cost = pl.CostEstimate(
        flops=(2 * Np * Ep * m_cols
               + 2 * Np * in_feats * out_pad
               + (0 if fold_wa else 2 * Np * added * out_pad)
               + 8 * Np * out_pad),
        transcendentals=Np,
        bytes_accessed=(2 * Np * Ep                          # inc (bf16), streamed once
                        + 2 * n_i_tiles * Ep * m_cols        # m (bf16), once per N tile
                        + 4 * Np * (in_feats + 1)            # h + norm
                        + 4 * Np * out_pad                   # output
                        + 4 * (in_feats + (0 if fold_wa else added) + 3) * out_pad),
    )

    if fold_wa:
        kernel = functools.partial(gcn_layer_fold_kernel, out_feats=out_feats)
    else:
        kernel = functools.partial(gcn_layer_split_kernel, out_feats=out_feats)

    def run(single_buffer):
        def inv(shape, index_map):
            # grid-invariant (or e-invariant) operands: single-buffer to save VMEM
            if single_buffer:
                return pl.BlockSpec(shape, index_map, pipeline_mode=pl.Buffered(1))
            return pl.BlockSpec(shape, index_map)

        in_specs = [
            inv((tm, in_feats), lambda i, e: (i, 0)),          # h     (e-invariant)
            pl.BlockSpec((te, m_cols), lambda i, e: (e, 0)),   # m     (bf16, streamed)
            pl.BlockSpec((tm, te), lambda i, e: (i, e)),       # inc   (bf16, streamed)
            inv((tm, 1), lambda i, e: (i, 0)),                 # norm  (e-invariant)
            inv((in_feats, out_pad), lambda i, e: (0, 0)),     # W_h   (resident)
        ]
        inputs = [h_p, m_p, inc_p, norm_p, w_h_p]
        if not fold_wa:
            in_specs.append(inv((added, out_pad), lambda i, e: (0, 0)))   # W_a (resident)
            inputs.append(w_a_p)
        in_specs += [inv((1, out_pad), lambda i, e: (0, 0)),   # bias
                     inv((1, out_pad), lambda i, e: (0, 0)),   # gamma
                     inv((1, out_pad), lambda i, e: (0, 0))]   # beta
        inputs += [b_p, g_p, be_p]

        return pl.pallas_call(
            kernel,
            out_shape=jax.ShapeDtypeStruct((Np, out_pad), jnp.float32),
            grid_spec=pltpu.PrefetchScalarGridSpec(
                num_scalar_prefetch=0,
                grid=grid,
                in_specs=in_specs,
                out_specs=pl.BlockSpec((tm, out_pad), lambda i, e: (i, 0)),
                scratch_shapes=[pltpu.VMEM((tm, acc_cols), jnp.float32)],  # ah accumulator
            ),
            compiler_params=pltpu.CompilerParams(
                dimension_semantics=("parallel", "arbitrary"),
                vmem_limit_bytes=vmem_limit,
            ),
            cost_estimate=cost,
        )(*inputs)

    if _SINGLE_BUFFER_OK:
        try:
            out_padded = run(True)
        except Exception:
            # pl.Buffered(1) not supported by this jax build -> default double buffering
            _SINGLE_BUFFER_OK = False
            out_padded = run(False)
    else:
        out_padded = run(False)

    return out_padded[:N, :out_feats]


def _reference(h, m, inc, norm, w, b, gamma, beta):
    ah = (inc @ m) * norm
    x = jnp.concatenate([h, ah], axis=1)
    y = x @ w.T + b
    mu = y.mean(axis=-1, keepdims=True)
    va = ((y - mu) ** 2).mean(axis=-1, keepdims=True)
    return jnp.maximum((y - mu) / jnp.sqrt(va + 1e-5) * gamma + beta, 0.0)


def _check(out, args, tight=True):
    h, m, inc, norm, w, b, gamma, beta = args
    ref = _reference(h, m, inc, norm, w, b, gamma, beta)
    assert out.shape == ref.shape
    # vs the pure-f32 reference: only deviation is the one-time bf16 rounding of m
    assert jnp.allclose(out, ref, atol=3e-2, rtol=3e-2), \
        float(jnp.max(jnp.abs(out - ref)))
    if tight:
        # bit-faithful check: same bf16 rounding applied to the reference's m
        m_q = m.astype(jnp.bfloat16).astype(jnp.float32)
        ref_q = _reference(h, m_q, inc, norm, w, b, gamma, beta)
        assert jnp.allclose(out, ref_q, atol=1e-4, rtol=1e-4), \
            float(jnp.max(jnp.abs(out - ref_q)))


def _make_inputs(key, N, E, in_feats, added, out_feats):
    k_h, k_m, k_dst, k_w, k_b = jax.random.split(key, 5)
    h = jax.random.normal(k_h, (N, in_feats), dtype=jnp.float32)
    m = jax.random.normal(k_m, (E, added), dtype=jnp.float32)
    # random graph -> dense incidence matrix (dst-node x edge)
    dst = jax.random.randint(k_dst, (E,), 0, N)
    inc = jnp.zeros((N, E), dtype=jnp.float32).at[dst, jnp.arange(E)].set(1.0)
    # DGL-style node norm (1/in-degree, 0 for isolated nodes), shape (N, 1)
    deg = inc.sum(axis=1, keepdims=True)
    norm = jnp.where(deg > 0, 1.0 / jnp.maximum(deg, 1.0), 0.0).astype(jnp.float32)
    # reset_parameters(): uniform(-stdv, stdv), stdv = 1/sqrt(in_feats + added)
    in_total = in_feats + added
    stdv = 1.0 / math.sqrt(in_total)
    w = jax.random.uniform(k_w, (out_feats, in_total), minval=-stdv, maxval=stdv,
                           dtype=jnp.float32)
    b = jax.random.uniform(k_b, (out_feats,), minval=-stdv, maxval=stdv,
                           dtype=jnp.float32)
    gamma = jnp.ones((out_feats,), dtype=jnp.float32)
    beta = jnp.zeros((out_feats,), dtype=jnp.float32)
    return h, m, inc, norm, w, b, gamma, beta


if __name__ == "__main__":
    key = jax.random.PRNGKey(0)
    k1, k2, k3 = jax.random.split(key, 3)

    # case 1: small shapes consistent with the module (single-tile fast path)
    args1 = _make_inputs(k1, N=16, E=32, in_feats=16, added=24, out_feats=32)
    out1 = gcn_layer_forward(*args1)
    jax.block_until_ready(out1)
    _check(out1, args1)

    # case 2: tiled path — multiple N tiles, multiple E reduction steps, padding
    args2 = _make_inputs(k2, N=20, E=300, in_feats=16, added=24, out_feats=32)
    out2 = gcn_layer_forward(*args2, tm_max=16, te_max=128)
    jax.block_until_ready(out2)
    _check(out2, args2)

    # case 3: wide edge features (added >= out_pad) -> W_a folded into m in the wrapper
    args3 = _make_inputs(k3, N=24, E=64, in_feats=16, added=256, out_feats=32)
    out3 = gcn_layer_forward(*args3)
    jax.block_until_ready(out3)
    _check(out3, args3, tight=False)

    print("KERNEL_OK")
</pallas_src>

<mosaic_0001>
module attributes {stable_mosaic.version = 11 : i64} {
  func.func @gcn_layer_split_kernel(%arg0: i32, %arg1: i32, %arg2: memref<16x16xf32, #tpu.memory_space<vmem>>, %arg3: memref<128x24xbf16, #tpu.memory_space<vmem>>, %arg4: memref<16x128xbf16, #tpu.memory_space<vmem>>, %arg5: memref<16x1xf32, #tpu.memory_space<vmem>>, %arg6: memref<16x128xf32, #tpu.memory_space<vmem>>, %arg7: memref<24x128xf32, #tpu.memory_space<vmem>>, %arg8: memref<1x128xf32, #tpu.memory_space<vmem>>, %arg9: memref<1x128xf32, #tpu.memory_space<vmem>>, %arg10: memref<1x128xf32, #tpu.memory_space<vmem>>, %arg11: memref<16x128xf32, #tpu.memory_space<vmem>>, %arg12: memref<16x24xf32, #tpu.memory_space<vmem>>) attributes {dimension_semantics = [#tpu.dimension_semantics<parallel>, #tpu.dimension_semantics<arbitrary>], iteration_bounds = array<i64: 1, 1>, scalar_prefetch = 0 : i64, scratch_operands = 1 : i64, tpu.core_type = #tpu.core_type<tc>, window_params = [{pipeline_mode = #tpu.pipeline_mode<synchronous>, transform_indices = @transform_0, window_bounds = array<i64: 16, 16>}, {transform_indices = @transform_1, window_bounds = array<i64: 128, 24>}, {transform_indices = @transform_2, window_bounds = array<i64: 16, 128>}, {pipeline_mode = #tpu.pipeline_mode<synchronous>, transform_indices = @transform_3, window_bounds = array<i64: 16, 1>}, {pipeline_mode = #tpu.pipeline_mode<synchronous>, transform_indices = @transform_4, window_bounds = array<i64: 16, 128>}, {pipeline_mode = #tpu.pipeline_mode<synchronous>, transform_indices = @transform_5, window_bounds = array<i64: 24, 128>}, {pipeline_mode = #tpu.pipeline_mode<synchronous>, transform_indices = @transform_6, window_bounds = array<i64: 1, 128>}, {pipeline_mode = #tpu.pipeline_mode<synchronous>, transform_indices = @transform_7, window_bounds = array<i64: 1, 128>}, {pipeline_mode = #tpu.pipeline_mode<synchronous>, transform_indices = @transform_8, window_bounds = array<i64: 1, 128>}, {transform_indices = @transform_9, window_bounds = array<i64: 16, 128>}]} {
    %c0_i32 = arith.constant 0 : i32
    %0 = arith.cmpi eq, %arg1, %c0_i32 : i32
    %1 = arith.extui %0 : i1 to i32
    %c0_i32_0 = arith.constant 0 : i32
    %2 = arith.cmpi ne, %1, %c0_i32_0 : i32
    scf.if %2 {
      %cst_10 = arith.constant 0.000000e+00 : f32
      %12 = vector.broadcast %cst_10 : f32 to vector<16x24xf32>
      %c0_11 = arith.constant 0 : index
      %c0_12 = arith.constant 0 : index
      %13 = vector.load %arg12[%c0_11, %c0_12] : memref<16x24xf32, #tpu.memory_space<vmem>>, vector<16x24xf32>
      tpu.vector_store %arg12[%c0_11, %c0_12], %12 {strides = array<i32>} : memref<16x24xf32, #tpu.memory_space<vmem>>, vector<16x24xf32>,
    } else {
    }
    %c0 = arith.constant 0 : index
    %c0_1 = arith.constant 0 : index
    %3 = vector.load %arg12[%c0, %c0_1] : memref<16x24xf32, #tpu.memory_space<vmem>>, vector<16x24xf32>
    %c0_2 = arith.constant 0 : index
    %c0_3 = arith.constant 0 : index
    %4 = vector.load %arg4[%c0_2, %c0_3] : memref<16x128xbf16, #tpu.memory_space<vmem>>, vector<16x128xbf16>
    %c0_4 = arith.constant 0 : index
    %c0_5 = arith.constant 0 : index
    %5 = vector.load %arg3[%c0_4, %c0_5] : memref<128x24xbf16, #tpu.memory_space<vmem>>, vector<128x24xbf16>
    %cst = arith.constant dense<0.000000e+00> : vector<16x24xf32>
    %6 = tpu.matmul %4, %5, %cst {dimension_numbers = #tpu.dot_dimension_numbers<[1], [0], [0], [1], [0, 0, 1, 1], [], []>} : vector<16x128xbf16>, vector<128x24xbf16>, vector<16x24xf32> -> vector<16x24xf32>
    %7 = arith.addf %3, %6 : vector<16x24xf32>
    %c0_6 = arith.constant 0 : index
    %c0_7 = arith.constant 0 : index
    %8 = vector.load %arg12[%c0_6, %c0_7] : memref<16x24xf32, #tpu.memory_space<vmem>>, vector<16x24xf32>
    tpu.vector_store %arg12[%c0_6, %c0_7], %7 {strides = array<i32>} : memref<16x24xf32, #tpu.memory_space<vmem>>, vector<16x24xf32>,
    %c0_i32_8 = arith.constant 0 : i32
    %9 = arith.cmpi eq, %arg1, %c0_i32_8 : i32
    %10 = arith.extui %9 : i1 to i32
    %c0_i32_9 = arith.constant 0 : i32
    %11 = arith.cmpi ne, %10, %c0_i32_9 : i32
    scf.if %11 {
      %c0_10 = arith.constant 0 : index
      %c0_11 = arith.constant 0 : index
      %12 = vector.load %arg12[%c0_10, %c0_11] : memref<16x24xf32, #tpu.memory_space<vmem>>, vector<16x24xf32>
      %c0_12 = arith.constant 0 : index
      %c0_13 = arith.constant 0 : index
      %13 = vector.load %arg5[%c0_12, %c0_13] : memref<16x1xf32, #tpu.memory_space<vmem>>, vector<16x1xf32>
      %14 = vector.broadcast %13 : vector<16x1xf32> to vector<16x24xf32>
      %15 = arith.mulf %12, %14 : vector<16x24xf32>
      %c0_14 = arith.constant 0 : index
      %c0_15 = arith.constant 0 : index
      %16 = vector.load %arg2[%c0_14, %c0_15] : memref<16x16xf32, #tpu.memory_space<vmem>>, vector<16x16xf32>
      %c0_16 = arith.constant 0 : index
      %c0_17 = arith.constant 0 : index
      %17 = vector.load %arg6[%c0_16, %c0_17] : memref<16x128xf32, #tpu.memory_space<vmem>>, vector<16x128xf32>
      %cst_18 = arith.constant dense<0.000000e+00> : vector<16x128xf32>
      %18 = tpu.matmul %16, %17, %cst_18 {dimension_numbers = #tpu.dot_dimension_numbers<[1], [0], [0], [1], [0, 0, 1, 1], [], []>} : vector<16x16xf32>, vector<16x128xf32>, vector<16x128xf32> -> vector<16x128xf32>
      %c0_19 = arith.constant 0 : index
      %c0_20 = arith.constant 0 : index
      %19 = vector.load %arg7[%c0_19, %c0_20] : memref<24x128xf32, #tpu.memory_space<vmem>>, vector<24x128xf32>
      %cst_21 = arith.constant dense<0.000000e+00> : vector<16x128xf32>
      %20 = tpu.matmul %15, %19, %cst_21 {dimension_numbers = #tpu.dot_dimension_numbers<[1], [0], [0], [1], [0, 0, 1, 1], [], []>} : vector<16x24xf32>, vector<24x128xf32>, vector<16x128xf32> -> vector<16x128xf32>
      %21 = arith.addf %18, %20 : vector<16x128xf32>
      %c0_22 = arith.constant 0 : index
      %c0_23 = arith.constant 0 : index
      %22 = vector.load %arg8[%c0_22, %c0_23] : memref<1x128xf32, #tpu.memory_space<vmem>>, vector<1x128xf32>
      %23 = vector.broadcast %22 : vector<1x128xf32> to vector<16x128xf32>
      %24 = arith.addf %21, %23 : vector<16x128xf32>
      %c0_24 = arith.constant 0 : index
      %c0_25 = arith.constant 0 : index
      %25 = vector.load %arg9[%c0_24, %c0_25] : memref<1x128xf32, #tpu.memory_space<vmem>>, vector<1x128xf32>
      %c0_26 = arith.constant 0 : index
      %c0_27 = arith.constant 0 : index
      %26 = vector.load %arg10[%c0_26, %c0_27] : memref<1x128xf32, #tpu.memory_space<vmem>>, vector<1x128xf32>
      %cst_28 = arith.constant dense<0.000000e+00> : vector<16xf32>
      %27 = vector.multi_reduction <add>, %24, %cst_28 [1] : vector<16x128xf32> to vector<16xf32>
      %28 = vector.shape_cast %27 : vector<16xf32> to vector<16x1xf32>
      %cst_29 = arith.constant 3.125000e-02 : f32
      %29 = vector.broadcast %cst_29 : f32 to vector<16x1xf32>
      %30 = arith.mulf %28, %29 : vector<16x1xf32>
      %31 = vector.broadcast %30 : vector<16x1xf32> to vector<16x128xf32>
      %32 = arith.subf %24, %31 : vector<16x128xf32>
      %33 = tpu.iota {dimensions = array<i32: 1>} : vector<16x128xi32>
      %c32_i32 = arith.constant 32 : i32
      %34 = vector.broadcast %c32_i32 : i32 to vector<16x128xi32>
      %35 = arith.cmpi slt, %33, %34 : vector<16x128xi32>
      %36 = arith.mulf %32, %32 : vector<16x128xf32>
      %cst_30 = arith.constant 0.000000e+00 : f32
      %37 = vector.broadcast %cst_30 : f32 to vector<16x128xf32>
      %38 = arith.select %35, %36, %37 : vector<16x128xi1>, vector<16x128xf32>
      %cst_31 = arith.constant dense<0.000000e+00> : vector<16xf32>
      %39 = vector.multi_reduction <add>, %38, %cst_31 [1] : vector<16x128xf32> to vector<16xf32>
      %40 = vector.shape_cast %39 : vector<16xf32> to vector<16x1xf32>
      %cst_32 = arith.constant 3.125000e-02 : f32
      %41 = vector.broadcast %cst_32 : f32 to vector<16x1xf32>
      %42 = arith.mulf %40, %41 : vector<16x1xf32>
      %cst_33 = arith.constant 9.99999974E-6 : f32
      %43 = vector.broadcast %cst_33 : f32 to vector<16x1xf32>
      %44 = arith.addf %42, %43 : vector<16x1xf32>
      %45 = math.rsqrt %44 : vector<16x1xf32>
      %46 = vector.broadcast %25 : vector<1x128xf32> to vector<16x128xf32>
      %47 = vector.broadcast %45 : vector<16x1xf32> to vector<16x128xf32>
      %48 = arith.mulf %46, %47 : vector<16x128xf32>
      %49 = arith.mulf %32, %48 : vector<16x128xf32>
      %50 = vector.broadcast %26 : vector<1x128xf32> to vector<16x128xf32>
      %51 = arith.addf %49, %50 : vector<16x128xf32>
      %cst_34 = arith.constant 0.000000e+00 : f32
      %52 = vector.broadcast %cst_34 : f32 to vector<16x128xf32>
      %53 = arith.maximumf %51, %52 : vector<16x128xf32>
      %c0_35 = arith.constant 0 : index
      %c0_36 = arith.constant 0 : index
      %54 = vector.load %arg11[%c0_35, %c0_36] : memref<16x128xf32, #tpu.memory_space<vmem>>, vector<16x128xf32>
      tpu.vector_store %arg11[%c0_35, %c0_36], %53 {strides = array<i32>} : memref<16x128xf32, #tpu.memory_space<vmem>>, vector<16x128xf32>,
    } else {
    }
    return
  }
  func.func @transform_0(%arg0: i32, %arg1: i32) -> (i32, i32) {
    %c0_i32 = arith.constant 0 : i32
    %c0_i32_0 = arith.constant 0 : i32
    return %arg0, %c0_i32 : i32, i32
  }
  func.func @transform_1(%arg0: i32, %arg1: i32) -> (i32, i32) {
    %c0_i32 = arith.constant 0 : i32
    %c0_i32_0 = arith.constant 0 : i32
    return %arg1, %c0_i32 : i32, i32
  }
  func.func @transform_2(%arg0: i32, %arg1: i32) -> (i32, i32) {
    %c0_i32 = arith.constant 0 : i32
    return %arg0, %arg1 : i32, i32
  }
  func.func @transform_3(%arg0: i32, %arg1: i32) -> (i32, i32) {
    %c0_i32 = arith.constant 0 : i32
    %c0_i32_0 = arith.constant 0 : i32
    return %arg0, %c0_i32 : i32, i32
  }
  func.func @transform_4(%arg0: i32, %arg1: i32) -> (i32, i32) {
    %c0_i32 = arith.constant 0 : i32
    %c0_i32_0 = arith.constant 0 : i32
    %c0_i32_1 = arith.constant 0 : i32
    return %c0_i32, %c0_i32_0 : i32, i32
  }
  func.func @transform_5(%arg0: i32, %arg1: i32) -> (i32, i32) {
    %c0_i32 = arith.constant 0 : i32
    %c0_i32_0 = arith.constant 0 : i32
    %c0_i32_1 = arith.constant 0 : i32
    return %c0_i32, %c0_i32_0 : i32, i32
  }
  func.func @transform_6(%arg0: i32, %arg1: i32) -> (i32, i32) {
    %c0_i32 = arith.constant 0 : i32
    %c0_i32_0 = arith.constant 0 : i32
    %c0_i32_1 = arith.constant 0 : i32
    return %c0_i32, %c0_i32_0 : i32, i32
  }
  func.func @transform_7(%arg0: i32, %arg1: i32) -> (i32, i32) {
    %c0_i32 = arith.constant 0 : i32
    %c0_i32_0 = arith.constant 0 : i32
    %c0_i32_1 = arith.constant 0 : i32
    return %c0_i32, %c0_i32_0 : i32, i32
  }
  func.func @transform_8(%arg0: i32, %arg1: i32) -> (i32, i32) {
    %c0_i32 = arith.constant 0 : i32
    %c0_i32_0 = arith.constant 0 : i32
    %c0_i32_1 = arith.constant 0 : i32
    return %c0_i32, %c0_i32_0 : i32, i32
  }
  func.func @transform_9(%arg0: i32, %arg1: i32) -> (i32, i32) {
    %c0_i32 = arith.constant 0 : i32
    %c0_i32_0 = arith.constant 0 : i32
    return %arg0, %c0_i32 : i32, i32
  }
}

module attributes {stable_mosaic.version = 11 : i64} {
  func.func @gcn_layer_split_kernel(%arg0: i32, %arg1: i32, %arg2: memref<16x16xf32, #tpu.memory_space<vmem>>, %arg3: memref<128x24xbf16, #tpu.memory_space<vmem>>, %arg4: memref<16x128xbf16, #tpu.memory_space<vmem>>, %arg5: memref<16x1xf32, #tpu.memory_space<vmem>>, %arg6: memref<16x128xf32, #tpu.memory_space<vmem>>, %arg7: memref<24x128xf32, #tpu.memory_space<vmem>>, %arg8: memref<1x128xf32, #tpu.memory_space<vmem>>, %arg9: memref<1x128xf32, #tpu.memory_space<vmem>>, %arg10: memref<1x128xf32, #tpu.memory_space<vmem>>, %arg11: memref<16x128xf32, #tpu.memory_space<vmem>>, %arg12: memref<16x24xf32, #tpu.memory_space<vmem>>) attributes {dimension_semantics = [#tpu.dimension_semantics<parallel>, #tpu.dimension_semantics<arbitrary>], iteration_bounds = array<i64: 1, 1>, scalar_prefetch = 0 : i64, scratch_operands = 1 : i64, tpu.core_type = #tpu.core_type<tc>, window_params = [{transform_indices = @transform_0, window_bounds = array<i64: 16, 16>}, {transform_indices = @transform_1, window_bounds = array<i64: 128, 24>}, {transform_indices = @transform_2, window_bounds = array<i64: 16, 128>}, {transform_indices = @transform_3, window_bounds = array<i64: 16, 1>}, {pipeline_mode = #tpu.pipeline_mode<synchronous>, transform_indices = @transform_4, window_bounds = array<i64: 16, 128>}, {pipeline_mode = #tpu.pipeline_mode<synchronous>, transform_indices = @transform_5, window_bounds = array<i64: 24, 128>}, {pipeline_mode = #tpu.pipeline_mode<synchronous>, transform_indices = @transform_6, window_bounds = array<i64: 1, 128>}, {pipeline_mode = #tpu.pipeline_mode<synchronous>, transform_indices = @transform_7, window_bounds = array<i64: 1, 128>}, {pipeline_mode = #tpu.pipeline_mode<synchronous>, transform_indices = @transform_8, window_bounds = array<i64: 1, 128>}, {transform_indices = @transform_9, window_bounds = array<i64: 16, 128>}]} {
    %c0_i32 = arith.constant 0 : i32
    %0 = arith.cmpi eq, %arg1, %c0_i32 : i32
    %1 = arith.extui %0 : i1 to i32
    %c0_i32_0 = arith.constant 0 : i32
    %2 = arith.cmpi ne, %1, %c0_i32_0 : i32
    scf.if %2 {
      %cst_10 = arith.constant 0.000000e+00 : f32
      %12 = vector.broadcast %cst_10 : f32 to vector<16x24xf32>
      %c0_11 = arith.constant 0 : index
      %c0_12 = arith.constant 0 : index
      %13 = vector.load %arg12[%c0_11, %c0_12] : memref<16x24xf32, #tpu.memory_space<vmem>>, vector<16x24xf32>
      tpu.vector_store %arg12[%c0_11, %c0_12], %12 {strides = array<i32>} : memref<16x24xf32, #tpu.memory_space<vmem>>, vector<16x24xf32>,
    } else {
    }
    %c0 = arith.constant 0 : index
    %c0_1 = arith.constant 0 : index
    %3 = vector.load %arg12[%c0, %c0_1] : memref<16x24xf32, #tpu.memory_space<vmem>>, vector<16x24xf32>
    %c0_2 = arith.constant 0 : index
    %c0_3 = arith.constant 0 : index
    %4 = vector.load %arg4[%c0_2, %c0_3] : memref<16x128xbf16, #tpu.memory_space<vmem>>, vector<16x128xbf16>
    %c0_4 = arith.constant 0 : index
    %c0_5 = arith.constant 0 : index
    %5 = vector.load %arg3[%c0_4, %c0_5] : memref<128x24xbf16, #tpu.memory_space<vmem>>, vector<128x24xbf16>
    %cst = arith.constant dense<0.000000e+00> : vector<16x24xf32>
    %6 = tpu.matmul %4, %5, %cst {dimension_numbers = #tpu.dot_dimension_numbers<[1], [0], [0], [1], [0, 0, 1, 1], [], []>} : vector<16x128xbf16>, vector<128x24xbf16>, vector<16x24xf32> -> vector<16x24xf32>
    %7 = arith.addf %3, %6 : vector<16x24xf32>
    %c0_6 = arith.constant 0 : index
    %c0_7 = arith.constant 0 : index
    %8 = vector.load %arg12[%c0_6, %c0_7] : memref<16x24xf32, #tpu.memory_space<vmem>>, vector<16x24xf32>
    tpu.vector_store %arg12[%c0_6, %c0_7], %7 {strides = array<i32>} : memref<16x24xf32, #tpu.memory_space<vmem>>, vector<16x24xf32>,
    %c0_i32_8 = arith.constant 0 : i32
    %9 = arith.cmpi eq, %arg1, %c0_i32_8 : i32
    %10 = arith.extui %9 : i1 to i32
    %c0_i32_9 = arith.constant 0 : i32
    %11 = arith.cmpi ne, %10, %c0_i32_9 : i32
    scf.if %11 {
      %c0_10 = arith.constant 0 : index
      %c0_11 = arith.constant 0 : index
      %12 = vector.load %arg12[%c0_10, %c0_11] : memref<16x24xf32, #tpu.memory_space<vmem>>, vector<16x24xf32>
      %c0_12 = arith.constant 0 : index
      %c0_13 = arith.constant 0 : index
      %13 = vector.load %arg5[%c0_12, %c0_13] : memref<16x1xf32, #tpu.memory_space<vmem>>, vector<16x1xf32>
      %14 = vector.broadcast %13 : vector<16x1xf32> to vector<16x24xf32>
      %15 = arith.mulf %12, %14 : vector<16x24xf32>
      %c0_14 = arith.constant 0 : index
      %c0_15 = arith.constant 0 : index
      %16 = vector.load %arg2[%c0_14, %c0_15] : memref<16x16xf32, #tpu.memory_space<vmem>>, vector<16x16xf32>
      %c0_16 = arith.constant 0 : index
      %c0_17 = arith.constant 0 : index
      %17 = vector.load %arg6[%c0_16, %c0_17] : memref<16x128xf32, #tpu.memory_space<vmem>>, vector<16x128xf32>
      %cst_18 = arith.constant dense<0.000000e+00> : vector<16x128xf32>
      %18 = tpu.matmul %16, %17, %cst_18 {dimension_numbers = #tpu.dot_dimension_numbers<[1], [0], [0], [1], [0, 0, 1, 1], [], []>} : vector<16x16xf32>, vector<16x128xf32>, vector<16x128xf32> -> vector<16x128xf32>
      %c0_19 = arith.constant 0 : index
      %c0_20 = arith.constant 0 : index
      %19 = vector.load %arg7[%c0_19, %c0_20] : memref<24x128xf32, #tpu.memory_space<vmem>>, vector<24x128xf32>
      %cst_21 = arith.constant dense<0.000000e+00> : vector<16x128xf32>
      %20 = tpu.matmul %15, %19, %cst_21 {dimension_numbers = #tpu.dot_dimension_numbers<[1], [0], [0], [1], [0, 0, 1, 1], [], []>} : vector<16x24xf32>, vector<24x128xf32>, vector<16x128xf32> -> vector<16x128xf32>
      %21 = arith.addf %18, %20 : vector<16x128xf32>
      %c0_22 = arith.constant 0 : index
      %c0_23 = arith.constant 0 : index
      %22 = vector.load %arg8[%c0_22, %c0_23] : memref<1x128xf32, #tpu.memory_space<vmem>>, vector<1x128xf32>
      %23 = vector.broadcast %22 : vector<1x128xf32> to vector<16x128xf32>
      %24 = arith.addf %21, %23 : vector<16x128xf32>
      %c0_24 = arith.constant 0 : index
      %c0_25 = arith.constant 0 : index
      %25 = vector.load %arg9[%c0_24, %c0_25] : memref<1x128xf32, #tpu.memory_space<vmem>>, vector<1x128xf32>
      %c0_26 = arith.constant 0 : index
      %c0_27 = arith.constant 0 : index
      %26 = vector.load %arg10[%c0_26, %c0_27] : memref<1x128xf32, #tpu.memory_space<vmem>>, vector<1x128xf32>
      %cst_28 = arith.constant dense<0.000000e+00> : vector<16xf32>
      %27 = vector.multi_reduction <add>, %24, %cst_28 [1] : vector<16x128xf32> to vector<16xf32>
      %28 = vector.shape_cast %27 : vector<16xf32> to vector<16x1xf32>
      %cst_29 = arith.constant 3.125000e-02 : f32
      %29 = vector.broadcast %cst_29 : f32 to vector<16x1xf32>
      %30 = arith.mulf %28, %29 : vector<16x1xf32>
      %31 = vector.broadcast %30 : vector<16x1xf32> to vector<16x128xf32>
      %32 = arith.subf %24, %31 : vector<16x128xf32>
      %33 = tpu.iota {dimensions = array<i32: 1>} : vector<16x128xi32>
      %c32_i32 = arith.constant 32 : i32
      %34 = vector.broadcast %c32_i32 : i32 to vector<16x128xi32>
      %35 = arith.cmpi slt, %33, %34 : vector<16x128xi32>
      %36 = arith.mulf %32, %32 : vector<16x128xf32>
      %cst_30 = arith.constant 0.000000e+00 : f32
      %37 = vector.broadcast %cst_30 : f32 to vector<16x128xf32>
      %38 = arith.select %35, %36, %37 : vector<16x128xi1>, vector<16x128xf32>
      %cst_31 = arith.constant dense<0.000000e+00> : vector<16xf32>
      %39 = vector.multi_reduction <add>, %38, %cst_31 [1] : vector<16x128xf32> to vector<16xf32>
      %40 = vector.shape_cast %39 : vector<16xf32> to vector<16x1xf32>
      %cst_32 = arith.constant 3.125000e-02 : f32
      %41 = vector.broadcast %cst_32 : f32 to vector<16x1xf32>
      %42 = arith.mulf %40, %41 : vector<16x1xf32>
      %cst_33 = arith.constant 9.99999974E-6 : f32
      %43 = vector.broadcast %cst_33 : f32 to vector<16x1xf32>
      %44 = arith.addf %42, %43 : vector<16x1xf32>
      %45 = math.rsqrt %44 : vector<16x1xf32>
      %46 = vector.broadcast %25 : vector<1x128xf32> to vector<16x128xf32>
      %47 = vector.broadcast %45 : vector<16x1xf32> to vector<16x128xf32>
      %48 = arith.mulf %46, %47 : vector<16x128xf32>
      %49 = arith.mulf %32, %48 : vector<16x128xf32>
      %50 = vector.broadcast %26 : vector<1x128xf32> to vector<16x128xf32>
      %51 = arith.addf %49, %50 : vector<16x128xf32>
      %cst_34 = arith.constant 0.000000e+00 : f32
      %52 = vector.broadcast %cst_34 : f32 to vector<16x128xf32>
      %53 = arith.maximumf %51, %52 : vector<16x128xf32>
      %c0_35 = arith.constant 0 : index
      %c0_36 = arith.constant 0 : index
      %54 = vector.load %arg11[%c0_35, %c0_36] : memref<16x128xf32, #tpu.memory_space<vmem>>, vector<16x128xf32>
      tpu.vector_store %arg11[%c0_35, %c0_36], %53 {strides = array<i32>} : memref<16x128xf32, #tpu.memory_space<vmem>>, vector<16x128xf32>,
    } else {
    }
    return
  }
  func.func @transform_0(%arg0: i32, %arg1: i32) -> (i32, i32) {
    %c0_i32 = arith.constant 0 : i32
    %c0_i32_0 = arith.constant 0 : i32
    return %arg0, %c0_i32 : i32, i32
  }
  func.func @transform_1(%arg0: i32, %arg1: i32) -> (i32, i32) {
    %c0_i32 = arith.constant 0 : i32
    %c0_i32_0 = arith.constant 0 : i32
    return %arg1, %c0_i32 : i32, i32
  }
  func.func @transform_2(%arg0: i32, %arg1: i32) -> (i32, i32) {
    %c0_i32 = arith.constant 0 : i32
    return %arg0, %arg1 : i32, i32
  }
  func.func @transform_3(%arg0: i32, %arg1: i32) -> (i32, i32) {
    %c0_i32 = arith.constant 0 : i32
    %c0_i32_0 = arith.constant 0 : i32
    return %arg0, %c0_i32 : i32, i32
  }
  func.func @transform_4(%arg0: i32, %arg1: i32) -> (i32, i32) {
    %c0_i32 = arith.constant 0 : i32
    %c0_i32_0 = arith.constant 0 : i32
    %c0_i32_1 = arith.constant 0 : i32
    return %c0_i32, %c0_i32_0 : i32, i32
  }
  func.func @transform_5(%arg0: i32, %arg1: i32) -> (i32, i32) {
    %c0_i32 = arith.constant 0 : i32
    %c0_i32_0 = arith.constant 0 : i32
    %c0_i32_1 = arith.constant 0 : i32
    return %c0_i32, %c0_i32_0 : i32, i32
  }
  func.func @transform_6(%arg0: i32, %arg1: i32) -> (i32, i32) {
    %c0_i32 = arith.constant 0 : i32
    %c0_i32_0 = arith.constant 0 : i32
    %c0_i32_1 = arith.constant 0 : i32
    return %c0_i32, %c0_i32_0 : i32, i32
  }
  func.func @transform_7(%arg0: i32, %arg1: i32) -> (i32, i32) {
    %c0_i32 = arith.constant 0 : i32
    %c0_i32_0 = arith.constant 0 : i32
    %c0_i32_1 = arith.constant 0 : i32
    return %c0_i32, %c0_i32_0 : i32, i32
  }
  func.func @transform_8(%arg0: i32, %arg1: i32) -> (i32, i32) {
    %c0_i32 = arith.constant 0 : i32
    %c0_i32_0 = arith.constant 0 : i32
    %c0_i32_1 = arith.constant 0 : i32
    return %c0_i32, %c0_i32_0 : i32, i32
  }
  func.func @transform_9(%arg0: i32, %arg1: i32) -> (i32, i32) {
    %c0_i32 = arith.constant 0 : i32
    %c0_i32_0 = arith.constant 0 : i32
    return %arg0, %c0_i32 : i32, i32
  }
}

</mosaic_0001>

<bundles_post_ra>
// kernel: tpu_custom_call.1
= control target key start
LH: loop header
LB: loop body
LE: loop exit
PB: predicated region body
PF: predicated region fallthrough
CT: control target
= control target key end

     0   :  { %v548_v1 = vmov 0.0   ;;  %vm549_vm0 = vmmov 0   ;;  %v550_v3 = vmov 0   ;;  %vm38_vm1 = vcmask 195584   ;;  %s685_s0 = inlined_call_operand.vmem [shape: f32[16,16], index: 0, kind: input, shape index: {}]   ;;  %s686_s1 = inlined_call_operand.vmem [shape: bf16[128,24], index: 1, kind: input, shape index: {}]   ;;  %s687_s2 = inlined_call_operand.vmem [shape: bf16[16,128], index: 2, kind: input, shape index: {}]   ;;  %s688_s3 = inlined_call_operand.vmem [shape: f32[16,1], index: 3, kind: input, shape index: {}]   ;;  %s689_s4 = inlined_call_operand.vmem [shape: f32[16,128], index: 4, kind: input, shape index: {}]   ;;  %s690_s5 = inlined_call_operand.vmem [shape: f32[24,128], index: 5, kind: input, shape index: {}]   ;;  %s691_s6 = inlined_call_operand.vmem [shape: f32[1,128], index: 6, kind: input, shape index: {}]   ;;  %s692_s7 = inlined_call_operand.vmem [shape: f32[1,128], index: 7, kind: input, shape index: {}]   ;;  %s693_s8 = inlined_call_operand.vmem [shape: f32[1,128], index: 8, kind: input, shape index: {}]   ;;  %s694_s9 = inlined_call_operand.hbm [shape: f32[16,128], index: 9, kind: output, shape index: {}]  }
   0x1   :  { %v511_v0 = vld [vmem:[%s686_s1] sm:$0xff]   ;;  %458 = vmatprep.subr.bf16.mxu0 %v548_v1  ;;  %v512_v2 = vld [vmem:[%s686_s1 + $0x8] sm:$0xff]   ;;  %474 = vmatprep.mubr.msk.bf16.mxu0 %vm549_vm0, %v548_v1  ;;  %39 = vst.msk [vmem:[#allocation2] sm:$0xff] %vm38_vm1, %v548_v1  ;;  %40 = vst.msk [vmem:[#allocation2 + $0x8] sm:$0xff] %vm38_vm1, %v548_v1 }
   0x2   :  { %459 = vmatpush3.bf16.msra.mxu0 %v511_v0  ;;  %510 = vset.pattern.permute.xlu0 %v550_v3  ;;  %v513_v4 = vld [vmem:[%s686_s1 + $0x10] sm:$0xff]   ;;  %v166_v5 = vld [vmem:[%s688_s3] sm:$0xff] }
   0x3   :  { %460 = vmatprep.subr.bf16.mxu0 %v548_v1 }
   0x6   :  { %461 = vmatpush3.bf16.msra.mxu0 %v512_v2 }
   0x7   :  { %462 = vmatprep.subr.bf16.mxu0 %v548_v1 }
   0x8   :  { %14 = vsyncpa [#allocation4], 0  ;;  %v514_v6 = vld [vmem:[%s686_s1 + $0x18] sm:$0xff]   ;;  %170 = vperm.xlu0 %510, %v166_v5   ;;  %v167_v7 = vld [vmem:[%s688_s3 + $0x8] sm:$0xff]  ;;  %vm268_vm2 = vcmask 130048   ;;  %v369_v41 = vlaneseq  ;;  %s551_s23 = smov [#allocation3]  }
   0x9   :  { %v515_v8 = vld [vmem:[%s686_s1 + $0x20] sm:$0xff]   ;;  %v516_v9 = vld [vmem:[%s686_s1 + $0x28] sm:$0xff]   ;;  %v517_v10 = vld [vmem:[%s686_s1 + $0x30] sm:$0xff]   ;;  %s413_s24 = sshll.u32 %s551_s23, 4  ;;  %s414_s24 = int_to_ptr.vmem [resolvable:$true] %s413_s24 }
   0xa   :  { %463 = vmatpush3.bf16.msra.mxu0 %v513_v4  ;;  %v518_v11 = vld [vmem:[%s686_s1 + $0x38] sm:$0xff]   ;;  %v519_v12 = vld [vmem:[%s687_s2] sm:$0xff]   ;;  %v185_v14 = vld [vmem:[%s690_s5 + $0x8] sm:$0xff]  ;;  %v370_v43 = vand.u32 127, %v369_v41  ;;  %p529_p1 = scmp.lt.s32.totalorder %s414_s24, %s414_s24 }
   0xb   :  { %464 = vmatprep.subr.bf16.mxu0 %v548_v1  ;;  %v184_v13 = vld [vmem:[%s690_s5] sm:$0xff]  ;;  %v186_v16 = vld [vmem:[%s690_s5 + $0x10] sm:$0xff]  ;;  %v183_v18 = vld [vmem:[%s689_s4 + $0x8] sm:$0xff] }
   0xc   :  { %175 = vperm.xlu0 %510, %v167_v7   ;;  %v494_v15 = vpack.c.bf16 %v185_v14, %v184_v13  ;;  %v182_v17 = vld [vmem:[%s689_s4] sm:$0xff]  ;;  %v42_v22 = vld [vmem:[#allocation2 + $0x8] sm:$0xff]  ;;  %vm371_vm3 = vcmp.lt.s32.totalorder %v370_v43, 32 }
   0xd   :  { %v498_v19 = vpack.c.bf16 %v183_v18, %v182_v17  ;;  %v41_v20 = vld [vmem:[#allocation2] sm:$0xff]  ;;  %v181_v35 = vld [vmem:[%s685_s0 + $0x8] sm:$0xff] }
   0xe   :  { %465 = vmatpush3.bf16.msra.mxu0 %v514_v6  ;;  %495 = vmatprep.subr.bf16.mxu1 %v494_v15  ;;  %v180_v34 = vld [vmem:[%s685_s0] sm:$0xff] }
   0xf   :  { %466 = vmatprep.subr.bf16.mxu0 %v548_v1  ;;  %497 = vmatpush3.bf16.msra.mxu1 %v494_v15  ;;  %v437_v36 = vld [vmem:[%s691_s6] ss:$0 sm:$0xff] }
  0x10   :  { %482 = vmatprep.subr.mxu1 %v186_v16  ;;  %v438_v59 = vld [vmem:[%s692_s7] ss:$0 sm:$0xff]  ;;  %s524_s7 = scalar_lea.vmem %s414_s24, 256 }
  0x11   :  { %v439_v62 = vld [vmem:[%s693_s8] ss:$0 sm:$0xff]  ;;  %p525_p0 = scmp.ne.s32.totalorder %s414_s24, %s524_s7  ;;  %p530_p2 = scmp.lt.s32.totalorder %s524_s7, %s524_s7 }
  0x12   :  { %467 = vmatpush3.bf16.msra.mxu0 %v515_v8 }
  0x13   :  { %468 = vmatprep.subr.bf16.mxu0 %v548_v1  ;;  %483 = vmatpush3.msra.mxu1 %v186_v16  ;;  %p531_p3 = por %p530_p2, %p529_p1 }
  0x14   :  { %499 = vmatprep.subr.bf16.mxu1 %v498_v19 }
  0x15   :  { %p532_p4 = pnand %p531_p3, %p525_p0 }
  0x16   :  { %469 = vmatpush3.bf16.msra.mxu0 %v516_v9 }
  0x17   :  { %470 = vmatprep.subr.bf16.mxu0 %v548_v1 }
  0x1a   :  { %471 = vmatpush3.bf16.msra.mxu0 %v517_v10 }
  0x1b   :  { %472 = vmatprep.subr.bf16.mxu0 %v548_v1 }
  0x1e   :  { %473 = vmatpush3.bf16.msra.mxu0 %v518_v11 }
  0x21   :  { %475 = vmatmul.mubr.bf16.vlgmr.msra.gmra.mrb[0].mxu0 %v519_v12 }
  0x87   :  { %v171_v28 = vpop.permute.xlu0 %170 }
  0x8b   :  { %v176_v31 = vpop.permute.xlu0 %175 }
  0xf4   :  { %v149_v21 = vpop.f32.mrb[0].mxu0 }
  0xf5   :  { %v156_v23 = vadd.f32 %v149_v21, %v41_v20  ;;  %v476_v24 = vpop.f32.mrb[1].mxu0 }
  0xf6   :  { %v152_v25 = vpop.f32.mrb[2].mxu0 }
  0xf7   :  { %159 = vst.msk [vmem:[#allocation2] sm:$0xff] %vm38_vm1, %v156_v23  ;;  %v157_v26 = vadd.f32 %v152_v25, %v42_v22  ;;  %v477_v27 = vpop.f32.mrb[3].mxu0 }
  0xf9   :  { %160 = vst.msk [vmem:[#allocation2 + $0x8] sm:$0xff] %vm38_vm1, %v157_v26 }
  0xfe   :  { %v164_v29 = vld [vmem:[#allocation2] sm:$0xff] }
  0xff   :  { %v178_v30 = vmul.f32 %v171_v28, %v164_v29 }
 0x100   :  { %v165_v32 = vld [vmem:[#allocation2 + $0x8] sm:$0xff] }
 0x101   :  { %v179_v33 = vmul.f32 %v176_v31, %v165_v32  ;;  %484 = vmatprep.mubr.msk.f32.mxu1 %vm38_vm1, %v178_v30 }
 0x103   :  { %485 = vmatmul.mubr.msk.f32.vlgmr.msra.gmra.mrb[0].mxu1 %vm38_vm1, %v179_v33 }
 0x104   :  { %501 = vmatpush3.bf16.msra.mxu1 %v498_v19  ;;  %491 = vmatprep.mubr.msk.f32.mxu1 %vm268_vm2, %v180_v34 }
 0x10b   :  { %492 = vmatmul.mubr.msk.f32.vlgmr.msra.gmra.mrb[0].mxu1 %vm268_vm2, %v181_v35 }
 0x1de   :  { %v493_v37 = vpop.f32.mrb[0].mxu1 }
 0x1df   :  { %v341_v38 = vpop.f32.mrb[1].mxu1  ;;  %v358_v40 = vadd.f32 %v493_v37, %v437_v36 }
 0x1e0   :  { %v357_v39 = vadd.f32 %v437_v36, %v341_v38 }
 0x1e2   :  { %361 = vadd.xlane.f32.xlu1 %v357_v39 }
 0x1e6   :  { %363 = vadd.xlane.f32.xlu1 %v358_v40 }
 0x26f   :  { %v362_v42 = vpop.xlane.xlu1 %361 }
 0x270   :  { %v365_v44 = vmul.f32 0.03125, %v362_v42 }
 0x272   :  { %v367_v45 = vsub.f32 %v357_v39, %v365_v44 }
 0x273   :  { %v364_v46 = vpop.xlane.xlu1 %363 }
 0x274   :  { %v366_v47 = vmul.f32 0.03125, %v364_v46  ;;  %v372_v48 = vmul.f32 %v367_v45, %v367_v45 }
 0x276   :  { %v368_v49 = vsub.f32 %v358_v40, %v366_v47  ;;  %v374_v50 = vsel %vm371_vm3, %v372_v48, 0.0 }
 0x277   :  { %376 = vadd.xlane.f32.xlu0 %v374_v50 }
 0x278   :  { %v373_v51 = vmul.f32 %v368_v49, %v368_v49 }
 0x27a   :  { %v375_v52 = vsel %vm371_vm3, %v373_v51, 0.0 }
 0x27b   :  { %378 = vadd.xlane.f32.xlu1 %v375_v52 }
 0x304   :  { %v377_v53 = vpop.xlane.xlu0 %376 }
 0x305   :  { %v380_v54 = vmul.f32 0.03125, %v377_v53 }
 0x307   :  { %v382_v55 = vadd.f32 1e-05, %v380_v54 }
 0x308   :  { %v379_v56 = vpop.xlane.xlu1 %378 }
 0x309   :  { %520 = vrsqrt.f32 %v382_v55  ;;  %v381_v57 = vmul.f32 0.03125, %v379_v56 }
 0x30b   :  { %v383_v58 = vadd.f32 1e-05, %v381_v57 }
 0x30d   :  { %522 = vrsqrt.f32 %v383_v58 }
 0x313   :  { %v521_v60 = vpop.eup %520 }
 0x314   :  { %v392_v61 = vmul.f32 %v521_v60, %v438_v59 }
 0x316   :  { %v394_v63 = vmul.f32 %v392_v61, %v367_v45 }
 0x317   :  { %v523_v0 = vpop.eup %522 }
 0x318   :  { %v393_v1 = vmul.f32 %v523_v0, %v438_v59  ;;  %v402_v2 = vadd.f32 %v439_v62, %v394_v63 }
 0x31a   :  { %v395_v3 = vmul.f32 %v393_v1, %v368_v49  ;;  %v404_v4 = vmax.f32 %v402_v2, 0.0 }
 0x31c   :  { %v403_v5 = vadd.f32 %v439_v62, %v395_v3  ;;  %406 = vst [vmem:[#allocation3] sm:$0xff] %v404_v4 }
 0x31e   :  { %v405_v6 = vmax.f32 %v403_v5, 0.0 }
 0x320   :  { %407 = vst [vmem:[#allocation3 + $0x8] sm:$0xff] %v405_v6 }
 0x321   :  { %535 = shalt.err (!%p532_p4)
}
 0x322   :  { %s536_s26 = scalar_lea.hbm %s694_s9, 256 }
 0x323   :  { %p537_p5 = scmp.ne.s32.totalorder %s694_s9, %s536_s26  ;;  %p540_p6 = scmp.lt.u32.totalorder %s536_s26, %s694_s9 }
 0x325   :  { %p542_p7 = pnand %p540_p6, %p537_p5 }
 0x327   :  { %545 = shalt.err (!%p542_p7)
}
 0x328   :  { %s552_s30 = smov 128   ;;  %s553_s10 = smov 8  }
 0x329   :  { %419 = dma.vmem_to_hbm [thread:$0]  %s414_s24, 256, %s694_s9, [#allocation4], %s552_s30, %s552_s30, %s553_s10  }
 0x32a   :  { %546 = dma.done.wait [#allocation4], 256  }
 0x32b   :  { %547 = vsyncadd [#allocation4], 4294967040 }
 0x32c   :  { %423 = vsyncpa [#allocation4], 1 }

// kernel: tpu_custom_call.1
= control target key start
LH: loop header
LB: loop body
LE: loop exit
PB: predicated region body
PF: predicated region fallthrough
CT: control target
= control target key end

     0   :  { %v548_v1 = vmov 0.0   ;;  %vm549_vm0 = vmmov 0   ;;  %v550_v3 = vmov 0   ;;  %vm38_vm1 = vcmask 195584   ;;  %s685_s0 = inlined_call_operand.vmem [shape: f32[16,16], index: 0, kind: input, shape index: {}]   ;;  %s686_s1 = inlined_call_operand.vmem [shape: bf16[128,24], index: 1, kind: input, shape index: {}]   ;;  %s687_s2 = inlined_call_operand.vmem [shape: bf16[16,128], index: 2, kind: input, shape index: {}]   ;;  %s688_s3 = inlined_call_operand.vmem [shape: f32[16,1], index: 3, kind: input, shape index: {}]   ;;  %s689_s4 = inlined_call_operand.vmem [shape: f32[16,128], index: 4, kind: input, shape index: {}]   ;;  %s690_s5 = inlined_call_operand.vmem [shape: f32[24,128], index: 5, kind: input, shape index: {}]   ;;  %s691_s6 = inlined_call_operand.vmem [shape: f32[1,128], index: 6, kind: input, shape index: {}]   ;;  %s692_s7 = inlined_call_operand.vmem [shape: f32[1,128], index: 7, kind: input, shape index: {}]   ;;  %s693_s8 = inlined_call_operand.vmem [shape: f32[1,128], index: 8, kind: input, shape index: {}]   ;;  %s694_s9 = inlined_call_operand.hbm [shape: f32[16,128], index: 9, kind: output, shape index: {}]  }
   0x1   :  { %v511_v0 = vld [vmem:[%s686_s1] sm:$0xff]   ;;  %458 = vmatprep.subr.bf16.mxu0 %v548_v1  ;;  %v512_v2 = vld [vmem:[%s686_s1 + $0x8] sm:$0xff]   ;;  %474 = vmatprep.mubr.msk.bf16.mxu0 %vm549_vm0, %v548_v1  ;;  %39 = vst.msk [vmem:[#allocation2] sm:$0xff] %vm38_vm1, %v548_v1  ;;  %40 = vst.msk [vmem:[#allocation2 + $0x8] sm:$0xff] %vm38_vm1, %v548_v1 }
   0x2   :  { %459 = vmatpush3.bf16.msra.mxu0 %v511_v0  ;;  %510 = vset.pattern.permute.xlu0 %v550_v3  ;;  %v513_v4 = vld [vmem:[%s686_s1 + $0x10] sm:$0xff]   ;;  %v166_v5 = vld [vmem:[%s688_s3] sm:$0xff] }
   0x3   :  { %460 = vmatprep.subr.bf16.mxu0 %v548_v1 }
   0x6   :  { %461 = vmatpush3.bf16.msra.mxu0 %v512_v2 }
   0x7   :  { %462 = vmatprep.subr.bf16.mxu0 %v548_v1 }
   0x8   :  { %14 = vsyncpa [#allocation4], 0  ;;  %v514_v6 = vld [vmem:[%s686_s1 + $0x18] sm:$0xff]   ;;  %170 = vperm.xlu0 %510, %v166_v5   ;;  %v167_v7 = vld [vmem:[%s688_s3 + $0x8] sm:$0xff]  ;;  %vm268_vm2 = vcmask 130048   ;;  %v369_v41 = vlaneseq  ;;  %s551_s23 = smov [#allocation3]  }
   0x9   :  { %v515_v8 = vld [vmem:[%s686_s1 + $0x20] sm:$0xff]   ;;  %v516_v9 = vld [vmem:[%s686_s1 + $0x28] sm:$0xff]   ;;  %v517_v10 = vld [vmem:[%s686_s1 + $0x30] sm:$0xff]   ;;  %s413_s24 = sshll.u32 %s551_s23, 4  ;;  %s414_s24 = int_to_ptr.vmem [resolvable:$true] %s413_s24 }
   0xa   :  { %463 = vmatpush3.bf16.msra.mxu0 %v513_v4  ;;  %v518_v11 = vld [vmem:[%s686_s1 + $0x38] sm:$0xff]   ;;  %v519_v12 = vld [vmem:[%s687_s2] sm:$0xff]   ;;  %v185_v14 = vld [vmem:[%s690_s5 + $0x8] sm:$0xff]  ;;  %v370_v43 = vand.u32 127, %v369_v41  ;;  %p529_p1 = scmp.lt.s32.totalorder %s414_s24, %s414_s24 }
   0xb   :  { %464 = vmatprep.subr.bf16.mxu0 %v548_v1  ;;  %v184_v13 = vld [vmem:[%s690_s5] sm:$0xff]  ;;  %v186_v16 = vld [vmem:[%s690_s5 + $0x10] sm:$0xff]  ;;  %v183_v18 = vld [vmem:[%s689_s4 + $0x8] sm:$0xff] }
   0xc   :  { %175 = vperm.xlu0 %510, %v167_v7   ;;  %v494_v15 = vpack.c.bf16 %v185_v14, %v184_v13  ;;  %v182_v17 = vld [vmem:[%s689_s4] sm:$0xff]  ;;  %v42_v22 = vld [vmem:[#allocation2 + $0x8] sm:$0xff]  ;;  %vm371_vm3 = vcmp.lt.s32.totalorder %v370_v43, 32 }
   0xd   :  { %v498_v19 = vpack.c.bf16 %v183_v18, %v182_v17  ;;  %v41_v20 = vld [vmem:[#allocation2] sm:$0xff]  ;;  %v181_v35 = vld [vmem:[%s685_s0 + $0x8] sm:$0xff] }
   0xe   :  { %465 = vmatpush3.bf16.msra.mxu0 %v514_v6  ;;  %495 = vmatprep.subr.bf16.mxu1 %v494_v15  ;;  %v180_v34 = vld [vmem:[%s685_s0] sm:$0xff] }
   0xf   :  { %466 = vmatprep.subr.bf16.mxu0 %v548_v1  ;;  %497 = vmatpush3.bf16.msra.mxu1 %v494_v15  ;;  %v437_v36 = vld [vmem:[%s691_s6] ss:$0 sm:$0xff] }
  0x10   :  { %482 = vmatprep.subr.mxu1 %v186_v16  ;;  %v438_v59 = vld [vmem:[%s692_s7] ss:$0 sm:$0xff]  ;;  %s524_s7 = scalar_lea.vmem %s414_s24, 256 }
  0x11   :  { %v439_v62 = vld [vmem:[%s693_s8] ss:$0 sm:$0xff]  ;;  %p525_p0 = scmp.ne.s32.totalorder %s414_s24, %s524_s7  ;;  %p530_p2 = scmp.lt.s32.totalorder %s524_s7, %s524_s7 }
  0x12   :  { %467 = vmatpush3.bf16.msra.mxu0 %v515_v8 }
  0x13   :  { %468 = vmatprep.subr.bf16.mxu0 %v548_v1  ;;  %483 = vmatpush3.msra.mxu1 %v186_v16  ;;  %p531_p3 = por %p530_p2, %p529_p1 }
  0x14   :  { %499 = vmatprep.subr.bf16.mxu1 %v498_v19 }
  0x15   :  { %p532_p4 = pnand %p531_p3, %p525_p0 }
  0x16   :  { %469 = vmatpush3.bf16.msra.mxu0 %v516_v9 }
  0x17   :  { %470 = vmatprep.subr.bf16.mxu0 %v548_v1 }
  0x1a   :  { %471 = vmatpush3.bf16.msra.mxu0 %v517_v10 }
  0x1b   :  { %472 = vmatprep.subr.bf16.mxu0 %v548_v1 }
  0x1e   :  { %473 = vmatpush3.bf16.msra.mxu0 %v518_v11 }
  0x21   :  { %475 = vmatmul.mubr.bf16.vlgmr.msra.gmra.mrb[0].mxu0 %v519_v12 }
  0x87   :  { %v171_v28 = vpop.permute.xlu0 %170 }
  0x8b   :  { %v176_v31 = vpop.permute.xlu0 %175 }
  0xf4   :  { %v149_v21 = vpop.f32.mrb[0].mxu0 }
  0xf5   :  { %v156_v23 = vadd.f32 %v149_v21, %v41_v20  ;;  %v476_v24 = vpop.f32.mrb[1].mxu0 }
  0xf6   :  { %v152_v25 = vpop.f32.mrb[2].mxu0 }
  0xf7   :  { %159 = vst.msk [vmem:[#allocation2] sm:$0xff] %vm38_vm1, %v156_v23  ;;  %v157_v26 = vadd.f32 %v152_v25, %v42_v22  ;;  %v477_v27 = vpop.f32.mrb[3].mxu0 }
  0xf9   :  { %160 = vst.msk [vmem:[#allocation2 + $0x8] sm:$0xff] %vm38_vm1, %v157_v26 }
  0xfe   :  { %v164_v29 = vld [vmem:[#allocation2] sm:$0xff] }
  0xff   :  { %v178_v30 = vmul.f32 %v171_v28, %v164_v29 }
 0x100   :  { %v165_v32 = vld [vmem:[#allocation2 + $0x8] sm:$0xff] }
 0x101   :  { %v179_v33 = vmul.f32 %v176_v31, %v165_v32  ;;  %484 = vmatprep.mubr.msk.f32.mxu1 %vm38_vm1, %v178_v30 }
 0x103   :  { %485 = vmatmul.mubr.msk.f32.vlgmr.msra.gmra.mrb[0].mxu1 %vm38_vm1, %v179_v33 }
 0x104   :  { %501 = vmatpush3.bf16.msra.mxu1 %v498_v19  ;;  %491 = vmatprep.mubr.msk.f32.mxu1 %vm268_vm2, %v180_v34 }
 0x10b   :  { %492 = vmatmul.mubr.msk.f32.vlgmr.msra.gmra.mrb[0].mxu1 %vm268_vm2, %v181_v35 }
 0x1de   :  { %v493_v37 = vpop.f32.mrb[0].mxu1 }
 0x1df   :  { %v341_v38 = vpop.f32.mrb[1].mxu1  ;;  %v358_v40 = vadd.f32 %v493_v37, %v437_v36 }
 0x1e0   :  { %v357_v39 = vadd.f32 %v437_v36, %v341_v38 }
 0x1e2   :  { %361 = vadd.xlane.f32.xlu1 %v357_v39 }
 0x1e6   :  { %363 = vadd.xlane.f32.xlu1 %v358_v40 }
 0x26f   :  { %v362_v42 = vpop.xlane.xlu1 %361 }
 0x270   :  { %v365_v44 = vmul.f32 0.03125, %v362_v42 }
 0x272   :  { %v367_v45 = vsub.f32 %v357_v39, %v365_v44 }
 0x273   :  { %v364_v46 = vpop.xlane.xlu1 %363 }
 0x274   :  { %v366_v47 = vmul.f32 0.03125, %v364_v46  ;;  %v372_v48 = vmul.f32 %v367_v45, %v367_v45 }
 0x276   :  { %v368_v49 = vsub.f32 %v358_v40, %v366_v47  ;;  %v374_v50 = vsel %vm371_vm3, %v372_v48, 0.0 }
 0x277   :  { %376 = vadd.xlane.f32.xlu0 %v374_v50 }
 0x278   :  { %v373_v51 = vmul.f32 %v368_v49, %v368_v49 }
 0x27a   :  { %v375_v52 = vsel %vm371_vm3, %v373_v51, 0.0 }
 0x27b   :  { %378 = vadd.xlane.f32.xlu1 %v375_v52 }
 0x304   :  { %v377_v53 = vpop.xlane.xlu0 %376 }
 0x305   :  { %v380_v54 = vmul.f32 0.03125, %v377_v53 }
 0x307   :  { %v382_v55 = vadd.f32 1e-05, %v380_v54 }
 0x308   :  { %v379_v56 = vpop.xlane.xlu1 %378 }
 0x309   :  { %520 = vrsqrt.f32 %v382_v55  ;;  %v381_v57 = vmul.f32 0.03125, %v379_v56 }
 0x30b   :  { %v383_v58 = vadd.f32 1e-05, %v381_v57 }
 0x30d   :  { %522 = vrsqrt.f32 %v383_v58 }
 0x313   :  { %v521_v60 = vpop.eup %520 }
 0x314   :  { %v392_v61 = vmul.f32 %v521_v60, %v438_v59 }
 0x316   :  { %v394_v63 = vmul.f32 %v392_v61, %v367_v45 }
 0x317   :  { %v523_v0 = vpop.eup %522 }
 0x318   :  { %v393_v1 = vmul.f32 %v523_v0, %v438_v59  ;;  %v402_v2 = vadd.f32 %v439_v62, %v394_v63 }
 0x31a   :  { %v395_v3 = vmul.f32 %v393_v1, %v368_v49  ;;  %v404_v4 = vmax.f32 %v402_v2, 0.0 }
 0x31c   :  { %v403_v5 = vadd.f32 %v439_v62, %v395_v3  ;;  %406 = vst [vmem:[#allocation3] sm:$0xff] %v404_v4 }
 0x31e   :  { %v405_v6 = vmax.f32 %v403_v5, 0.0 }
 0x320   :  { %407 = vst [vmem:[#allocation3 + $0x8] sm:$0xff] %v405_v6 }
 0x321   :  { %535 = shalt.err (!%p532_p4)
}
 0x322   :  { %s536_s26 = scalar_lea.hbm %s694_s9, 256 }
 0x323   :  { %p537_p5 = scmp.ne.s32.totalorder %s694_s9, %s536_s26  ;;  %p540_p6 = scmp.lt.u32.totalorder %s536_s26, %s694_s9 }
 0x325   :  { %p542_p7 = pnand %p540_p6, %p537_p5 }
 0x327   :  { %545 = shalt.err (!%p542_p7)
}
 0x328   :  { %s552_s30 = smov 128   ;;  %s553_s10 = smov 8  }
 0x329   :  { %419 = dma.vmem_to_hbm [thread:$0]  %s414_s24, 256, %s694_s9, [#allocation4], %s552_s30, %s552_s30, %s553_s10  }
 0x32a   :  { %546 = dma.done.wait [#allocation4], 256  }
 0x32b   :  { %547 = vsyncadd [#allocation4], 4294967040 }
 0x32c   :  { %423 = vsyncpa [#allocation4], 1 }

</bundles_post_ra>
